<compile_context>
chip_gen: v7x
topology: tpu7x:2x2x1
jax: 0.10.0
libtpu: 0.0.40
codegen_flags: <defaults>
</compile_context>

<pallas_src>
from functools import partial

import jax
import jax.numpy as jnp
from jax.experimental import pallas as pl
from jax.experimental.pallas import tpu as pltpu


# ---------------------------------------------------------------------------
# Kernels
# ---------------------------------------------------------------------------

def _dilated_conv1d_full_kernel(x_ref, w_ref, o_ref, *, dilation, l_out):
    """Single-block path: the whole (C_in, L) sequence is resident in VMEM.

    x_ref : (1, C_in, L)       full input sequence for one batch element
    w_ref : (2, C_out, C_in)   weight taps (resident across the grid)
    o_ref : (1, C_out, L_out)  lane-dense output
    """
    x = x_ref[0]
    acc = jnp.dot(w_ref[0], x[:, :l_out], preferred_element_type=jnp.float32)
    acc = acc + jnp.dot(w_ref[1], x[:, dilation:dilation + l_out],
                        preferred_element_type=jnp.float32)
    o_ref[0] = acc.astype(o_ref.dtype)


def _dilated_conv1d_tiled_kernel(x_ref, h_ref, w_ref, o_ref, *, dilation):
    """Time-tiled path: one main tile + a tiny halo tile per grid step.

    x_ref : (1, C_in, TL)      x[b, :, t*TL : (t+1)*TL]
    h_ref : (1, C_in, H)       x[b, :, (t+1)*TL : (t+1)*TL + H]   (H >= dilation)
    w_ref : (2, C_out, C_in)   weight taps (constant block index -> resident)
    o_ref : (1, C_out, TL)     out[b, :, t*TL : (t+1)*TL]
    """
    x0 = x_ref[0]
    tl = x0.shape[-1]
    halo = h_ref[0]
    # Tap-1 (x[t + d]) is served from the SAME in-VMEM tile plus the halo; the
    # lane-shifted slice/concat lowers to XLU/VPU selects, a free slot on this
    # memory-bound op.
    if dilation < tl:
        x1 = jnp.concatenate([x0[:, dilation:], halo[:, :dilation]], axis=-1)
    else:  # dilation == tl (only when dilation is a multiple of 128)
        x1 = halo[:, :tl]
    acc = jnp.dot(w_ref[0], x0, preferred_element_type=jnp.float32)
    acc = acc + jnp.dot(w_ref[1], x1, preferred_element_type=jnp.float32)
    # Columns past L_out in the last (partial) tile may be fed stale VMEM
    # lanes; Pallas discards those output columns on writeback, so this is
    # correct (see halo_map clamp note in the wrapper).
    o_ref[0] = acc.astype(o_ref.dtype)


# ---------------------------------------------------------------------------
# Tiling / wrapper
# ---------------------------------------------------------------------------

def _physical_vmem_bytes():
    try:
        info = pltpu.get_tpu_info()
        for attr in ("vmem_capacity_bytes", "vmem_bytes", "vmem_size_bytes"):
            v = getattr(info, attr, None)
            if v:
                return int(v)
    except Exception:
        pass
    return 64 * 1024 * 1024  # conservative fallback (v7x per-TensorCore VMEM)


def _pick_time_tile(n, l_out, per_lane_bytes, halo):
    """Pick the time-tile width TL (a multiple of `halo`, itself a multiple of 128)."""
    # Per-step single-buffer budget ~= physical VMEM / 8 (=> ~1/4 once the
    # auto-pipeline double-buffers): ~8 MiB on v7x (64 MiB), ~16 MiB on
    # v5e/v6e (128 MiB).
    budget = max(2 << 20, min(16 << 20, _physical_vmem_bytes() // 8))
    tl = max(halo, (budget // max(per_lane_bytes, 1)) // halo * halo)
    # Keep per-step HBM traffic >= ~1 MiB so the ~0.35 us fixed per-grid-step
    # cost stays amortized (matters at small channel counts).
    min_tl = max(halo, ((1 << 20) // max(per_lane_bytes, 1)) // halo * halo)
    # Aim for >= 4 total grid steps when that does not violate the traffic
    # floor: keeps both v7x TensorCores fed (all grid axes are "parallel") and
    # gives the software pipeline something to overlap.
    if n * pl.cdiv(l_out, tl) < 4:
        want_t = pl.cdiv(4, n)
        tl_split = pl.cdiv(pl.cdiv(l_out, want_t), halo) * halo
        tl = max(min(tl, tl_split), min_tl)
    if tl >= l_out:
        return l_out  # single full-extent block per batch element
    return tl


def dilated_conv1d(x, weight, dilation=1, out_dtype=None):
    """WaveNet DilatedConv1d forward.

    x      : (N, C_in, L)        activations (compute dtype == x.dtype)
    weight : (C_out, C_in, 2)    nn.Conv1d(C, C, kernel_size=2, bias=False) weight
    returns (N, C_out, L - dilation) in `out_dtype` (default: x.dtype)
    """
    n, c_in, l = x.shape
    c_out = weight.shape[0]
    assert weight.shape == (c_out, c_in, 2), weight.shape
    assert dilation >= 1
    l_out = l - dilation
    assert l_out > 0, "sequence too short for this dilation"
    out_dtype = x.dtype if out_dtype is None else jnp.dtype(out_dtype)

    # Weight taps -> one resident (2, C_out, C_in) operand.  (Leaving the
    # trailing tap axis of size 2 on the lane dimension would pad 2->128 lanes
    # in VMEM.)  This touches only O(C^2) bytes, so unlike the activations it
    # is fine to reorder/cast outside the kernel.
    w = jnp.transpose(weight, (2, 0, 1)).astype(x.dtype)

    in_isz = jnp.dtype(x.dtype).itemsize
    out_isz = jnp.dtype(out_dtype).itemsize
    per_lane_bytes = c_in * in_isz + c_out * out_isz

    halo = 128 * pl.cdiv(dilation, 128)          # lane-aligned halo width >= dilation
    tl = _pick_time_tile(n, l_out, per_lane_bytes, halo)

    w_bytes = 2 * c_out * c_in * in_isz
    phys = _physical_vmem_bytes()

    if tl >= l_out:
        # --- Path A: one full-extent time block per batch element ----------
        need = 2 * (c_in * l * in_isz + c_out * l_out * out_isz) + 2 * w_bytes + (2 << 20)
        vmem_limit = int(min(max(need, 16 << 20), phys * 3 // 4))
        kernel = partial(_dilated_conv1d_full_kernel, dilation=dilation, l_out=l_out)
        return pl.pallas_call(
            kernel,
            out_shape=jax.ShapeDtypeStruct((n, c_out, l_out), out_dtype),
            grid_spec=pltpu.PrefetchScalarGridSpec(
                num_scalar_prefetch=0,
                grid=(n,),
                in_specs=[
                    pl.BlockSpec((1, c_in, l), lambda b: (b, 0, 0)),
                    pl.BlockSpec((2, c_out, c_in), lambda b: (0, 0, 0)),
                ],
                out_specs=pl.BlockSpec((1, c_out, l_out), lambda b: (b, 0, 0)),
            ),
            compiler_params=pltpu.CompilerParams(
                dimension_semantics=("parallel",),
                vmem_limit_bytes=vmem_limit,
            ),
        )(x, w)

    # --- Path B: time-tiled grid with a small halo operand ----------------
    num_t = pl.cdiv(l_out, tl)
    ratio = tl // halo                      # tl is a multiple of halo
    last_halo_block = (l - 1) // halo       # last halo block starting in-bounds

    def x_map(b, t):
        return (b, 0, t)

    def halo_map(b, t):
        # Clamp so the halo DMA never starts past the end of x.  Whenever the
        # clamp actually changes the index, every output column that would
        # consume the halo lies at or beyond L_out and is discarded by Pallas,
        # so reading the clamped (wrong-position) halo data is harmless.
        return (b, 0, jnp.minimum((t + 1) * ratio, last_halo_block))

    def w_map(b, t):
        return (0, 0, 0)

    need = (2 * (c_in * tl * in_isz + c_in * halo * in_isz + c_out * tl * out_isz)
            + 2 * w_bytes + (2 << 20))
    vmem_limit = int(min(max(need, 16 << 20), phys * 3 // 4))

    kernel = partial(_dilated_conv1d_tiled_kernel, dilation=dilation)
    return pl.pallas_call(
        kernel,
        out_shape=jax.ShapeDtypeStruct((n, c_out, l_out), out_dtype),
        grid_spec=pltpu.PrefetchScalarGridSpec(
            num_scalar_prefetch=0,
            grid=(n, num_t),
            in_specs=[
                pl.BlockSpec((1, c_in, tl), x_map),       # main tile of x
                pl.BlockSpec((1, c_in, halo), halo_map),  # tiny +TL halo of the SAME x
                pl.BlockSpec((2, c_out, c_in), w_map),    # resident weight taps
            ],
            out_specs=pl.BlockSpec((1, c_out, tl), x_map),
        ),
        compiler_params=pltpu.CompilerParams(
            dimension_semantics=("parallel", "parallel"),
            vmem_limit_bytes=vmem_limit,
        ),
    )(x, x, w)   # x passed twice: same HBM buffer viewed by two BlockSpecs (no copy)


# ---------------------------------------------------------------------------
# Harness
# ---------------------------------------------------------------------------

if __name__ == "__main__":
    key = jax.random.PRNGKey(0)
    k_x, k_w, k_x2, k_w2 = jax.random.split(key, 4)

    # --- Small shape implied by the module (Path A). -----------------------
    batch, channels, length, dilation = 2, 4, 16, 2
    x = jax.random.normal(k_x, (batch, channels, length), dtype=jnp.float32)
    fan_in = channels * 2
    bound = 1.0 / (fan_in ** 0.5)
    weight = jax.random.uniform(k_w, (channels, channels, 2), dtype=jnp.float32,
                                minval=-bound, maxval=bound)

    out = jax.block_until_ready(dilated_conv1d(x, weight, dilation=dilation))
    ref = jax.lax.conv_general_dilated(
        x, weight, window_strides=(1,), padding="VALID", rhs_dilation=(dilation,),
        dimension_numbers=("NCH", "OIH", "NCH"),
        precision=jax.lax.Precision.HIGHEST)
    assert out.shape == (batch, channels, length - dilation), out.shape
    assert jnp.allclose(out, ref, atol=1e-5, rtol=1e-5), "mismatch vs reference (small)"

    # bf16 activations arriving from upstream (no wrapper cast of x), bf16 out.
    out_bf16 = jax.block_until_ready(
        dilated_conv1d(x.astype(jnp.bfloat16), weight, dilation=dilation,
                       out_dtype=jnp.bfloat16))
    assert out_bf16.shape == ref.shape
    assert jnp.allclose(out_bf16.astype(jnp.float32), ref, atol=5e-2, rtol=5e-2), \
        "bf16 mismatch vs reference"

    # --- Longer sequence: exercises the time-tiled path (interior halo use,
    #     partial final tile, clamped halo index). --------------------------
    batch2, channels2, dilation2 = 1, 8, 4
    length2 = 32768 + dilation2 + 60
    x2 = jax.random.normal(k_x2, (batch2, channels2, length2), dtype=jnp.float32)
    bound2 = 1.0 / ((channels2 * 2) ** 0.5)
    weight2 = jax.random.uniform(k_w2, (channels2, channels2, 2), dtype=jnp.float32,
                                 minval=-bound2, maxval=bound2)

    out2 = jax.block_until_ready(dilated_conv1d(x2, weight2, dilation=dilation2))
    ref2 = jax.lax.conv_general_dilated(
        x2, weight2, window_strides=(1,), padding="VALID", rhs_dilation=(dilation2,),
        dimension_numbers=("NCH", "OIH", "NCH"),
        precision=jax.lax.Precision.HIGHEST)
    assert out2.shape == ref2.shape, (out2.shape, ref2.shape)
    assert jnp.allclose(out2, ref2, atol=2e-4, rtol=2e-4), "mismatch vs reference (tiled)"

    print("KERNEL_OK")
</pallas_src>

<mosaic_0001>
module attributes {stable_mosaic.version = 11 : i64} {
  func.func @_dilated_conv1d_full_kernel(%arg0: i32, %arg1: memref<1x4x16xf32, #tpu.memory_space<vmem>>, %arg2: memref<2x4x4xf32, #tpu.memory_space<vmem>>, %arg3: memref<1x4x14xf32, #tpu.memory_space<vmem>>) attributes {dimension_semantics = [#tpu.dimension_semantics<parallel>], iteration_bounds = array<i64: 2>, scalar_prefetch = 0 : i64, scratch_operands = 0 : i64, tpu.core_type = #tpu.core_type<tc>, window_params = [{transform_indices = @transform_0, window_bounds = array<i64: 1, 4, 16>}, {pipeline_mode = #tpu.pipeline_mode<synchronous>, transform_indices = @transform_1, window_bounds = array<i64: 2, 4, 4>}, {transform_indices = @transform_2, window_bounds = array<i64: 1, 4, 14>}]} {
    %c0 = arith.constant 0 : index
    %c0_0 = arith.constant 0 : index
    %c0_1 = arith.constant 0 : index
    %0 = vector.load %arg1[%c0, %c0_0, %c0_1] : memref<1x4x16xf32, #tpu.memory_space<vmem>>, vector<1x4x16xf32>
    %1 = vector.shape_cast %0 : vector<1x4x16xf32> to vector<4x16xf32>
    %c0_2 = arith.constant 0 : index
    %c0_3 = arith.constant 0 : index
    %c0_4 = arith.constant 0 : index
    %2 = vector.load %arg2[%c0_2, %c0_3, %c0_4] : memref<2x4x4xf32, #tpu.memory_space<vmem>>, vector<1x4x4xf32>
    %3 = vector.shape_cast %2 : vector<1x4x4xf32> to vector<4x4xf32>
    %4 = vector.extract_strided_slice %1 {offsets = [0, 0], sizes = [4, 14], strides = [1, 1]} : vector<4x16xf32> to vector<4x14xf32>
    %cst = arith.constant dense<0.000000e+00> : vector<4x14xf32>
    %5 = tpu.matmul %3, %4, %cst {dimension_numbers = #tpu.dot_dimension_numbers<[1], [0], [0], [1], [0, 0, 1, 1], [], []>} : vector<4x4xf32>, vector<4x14xf32>, vector<4x14xf32> -> vector<4x14xf32>
    %c1 = arith.constant 1 : index
    %c0_5 = arith.constant 0 : index
    %c0_6 = arith.constant 0 : index
    %6 = vector.load %arg2[%c1, %c0_5, %c0_6] : memref<2x4x4xf32, #tpu.memory_space<vmem>>, vector<1x4x4xf32>
    %7 = vector.shape_cast %6 : vector<1x4x4xf32> to vector<4x4xf32>
    %8 = vector.extract_strided_slice %1 {offsets = [0, 2], sizes = [4, 14], strides = [1, 1]} : vector<4x16xf32> to vector<4x14xf32>
    %cst_7 = arith.constant dense<0.000000e+00> : vector<4x14xf32>
    %9 = tpu.matmul %7, %8, %cst_7 {dimension_numbers = #tpu.dot_dimension_numbers<[1], [0], [0], [1], [0, 0, 1, 1], [], []>} : vector<4x4xf32>, vector<4x14xf32>, vector<4x14xf32> -> vector<4x14xf32>
    %10 = arith.addf %5, %9 : vector<4x14xf32>
    %c0_8 = arith.constant 0 : index
    %c0_9 = arith.constant 0 : index
    %c0_10 = arith.constant 0 : index
    %11 = vector.load %arg3[%c0_8, %c0_9, %c0_10] : memref<1x4x14xf32, #tpu.memory_space<vmem>>, vector<1x4x14xf32>
    %12 = vector.shape_cast %11 : vector<1x4x14xf32> to vector<4x14xf32>
    %13 = vector.shape_cast %10 : vector<4x14xf32> to vector<1x4x14xf32>
    tpu.vector_store %arg3[%c0_8, %c0_9, %c0_10], %13 {strides = array<i32>} : memref<1x4x14xf32, #tpu.memory_space<vmem>>, vector<1x4x14xf32>,
    return
  }
  func.func @transform_0(%arg0: i32) -> (i32, i32, i32) {
    %c0_i32 = arith.constant 0 : i32
    %c0_i32_0 = arith.constant 0 : i32
    %c0_i32_1 = arith.constant 0 : i32
    return %arg0, %c0_i32, %c0_i32_0 : i32, i32, i32
  }
  func.func @transform_1(%arg0: i32) -> (i32, i32, i32) {
    %c0_i32 = arith.constant 0 : i32
    %c0_i32_0 = arith.constant 0 : i32
    %c0_i32_1 = arith.constant 0 : i32
    %c0_i32_2 = arith.constant 0 : i32
    return %c0_i32, %c0_i32_0, %c0_i32_1 : i32, i32, i32
  }
  func.func @transform_2(%arg0: i32) -> (i32, i32, i32) {
    %c0_i32 = arith.constant 0 : i32
    %c0_i32_0 = arith.constant 0 : i32
    %c0_i32_1 = arith.constant 0 : i32
    return %arg0, %c0_i32, %c0_i32_0 : i32, i32, i32
  }
}

</mosaic_0001>

<bundles_post_ra>
// kernel: tpu_custom_call.1
= control target key start
LH: loop header
LB: loop body
LE: loop exit
PB: predicated region body
PF: predicated region fallthrough
CT: control target
= control target key end

     0   :  { %7 = vsyncpa [#allocation3], 0  ;;  %s873_s0 = inlined_call_operand.hbm [shape: f32[2,4,16], index: 0, kind: input, shape index: {}]   ;;  %s874_s1 = inlined_call_operand.hbm [shape: f32[2,4,4], index: 1, kind: input, shape index: {}]   ;;  %s875_s2 = inlined_call_operand.hbm [shape: f32[2,4,14], index: 2, kind: output, shape index: {}]  }
   0x1   :  { %9 = vsyncpa [#allocation3 + $0x1], 0 }
   0x2   :  { %10 = vsyncpa [#allocation6], 0 }
   0x3   :  { %11 = vsyncpa [#allocation4], 0 }
   0x4   :  { %13 = vsyncpa [#allocation4 + $0x1], 0  ;;  %s677_s9 = smov 0   ;;  %s679_s10 = smov 0  }
   0x5   :  { %s681_s11 = smov 0   ;;  %s683_s12 = smov 0  }
   0x6 LB: > { %s698_s13 = sadd.s32 4294967295, %s652_s12   ;;  %s429_s14 = sadd.s32 4294967294, %s652_s12   ;;  %s652_s12 = sphi %s683_s12, %s895_s12   ;;  %s648_s11 = sphi %s681_s11, %s894_s11   ;;  %s644_s10 = sphi %s679_s10, %s893_s10   ;;  %s640_s9 = sphi %s677_s9, %s892_s9  }
   0x7   : > { %p39_p0 = scmp.ne.s32.totalorder %s644_s10, %s640_s9  ;;  %p876_p1 = scmp.eq.s32.totalorder %s698_s13, 0 }
   0x8   : > { %p90_p3 = scmp.eq.s32.totalorder %s429_s14, 1  ;;  %p430_p5 = scmp.ge.s32.totalorder %s652_s12, 1 }
   0x9   : > { %p707_p4 = por %p876_p1, %p39_p0  ;;  %p97_p7 = scmp.lt.s32.totalorder %s652_s12, 3 }
   0xa   : > { %p712_p6 = por %p90_p3, %p39_p0  ;;  %s654_s18 = smov [#allocation5]  }
   0xb   : > { %s879_s15 = scalar_select %p707_p4, 1, 0 }
   0xc   : > { %s880_s16 = scalar_select %p712_p6, 1, 0 }
   0xd   : > { %p717_p8 = pnand %p430_p5, %p97_p7  ;;  %s109_s19 = sshll.u32 %s654_s18, 4  ;;  %s721_s19 = int_to_ptr.vmem [resolvable:$true] %s109_s19 }
   0xe   : > { %s733_s21 = sadd.s32 1, %s652_s12   ;;  %s26_s22 = sadd.s32 1, %s648_s11 }
   0xf   : > { %s881_s17 = scalar_select %p717_p8, 1, 0 }
  0x10   : > { %p470_p9 = pneg %p717_p8  ;;  %s23_s23 = ssub.s32 %s652_s12, %s733_s21 }
  0x11   : > { %s524_s26 = scalar_lea.hbm %s874_s1, 128 }
  0x12   : > { %p728_p11 = pnand %p470_p9, %p876_p1  ;;  %p525_p12 = scmp.ne.s32.totalorder %s874_s1, %s524_s26 }
  0x13   : > { %p531_p5 = scmp.lt.u32.totalorder %s524_s26, %s874_s1 }
  0x14   : > { %p526_p13 = pneg %p728_p11 }
  0x16   : > { %p527_p0 = pnand %p526_p13, %p525_p12 }
  0x18   : > { %p528_p3 = pneg %p527_p0 }
  0x1a   : > { %p533_p7 = pnand %p531_p5, %p528_p3 }
  0x1c   : > { %536 = shalt.err (!%p533_p7)
}
  0x1d   : > { %s537_s3 = scalar_lea.vmem %s721_s19, 128  ;;  %p545_p2 = scmp.lt.s32.totalorder %s721_s19, %s721_s19 }
  0x1e   : > { %p538_p9 = scmp.ne.s32.totalorder %s721_s19, %s537_s3  ;;  %p546_p6 = scmp.lt.s32.totalorder %s537_s3, %s537_s3 }
  0x20   : > { %p540_p10 = pnand %p538_p9, %p526_p13  ;;  %p547_p4 = por %p546_p6, %p545_p2 }
  0x22   : > { %p541_p1 = pneg %p540_p10 }
  0x24   : > { %p548_p8 = pnand %p547_p4, %p541_p1 }
  0x26   : > { %551 = shalt.err (!%p548_p8)
}
  0x27   : > { %s655_s4 = smov 64   ;;  %s656_s5 = smov 4  }
  0x28   : > { %473 = dma.hbm_to_vmem [thread:$0]  (!%p728_p11), %s874_s1, 128, %s721_s19, [#allocation6], %s655_s4, %s655_s4, %s656_s5  }
  0x29   : > { %p24_p2 = scmp.eq.s32.totalorder %s23_s23, 0  ;;  %p33_p1 = scmp.ne.s32.totalorder %s648_s11, %s644_s10 }
  0x2a   : > { %p34_p4 = scmp.eq.s32.totalorder %s652_s12, 0  ;;  %p483_p6 = scmp.lt.s32.totalorder %s652_s12, 2 }
  0x2b   : > { %s764_s8 = scalar_select %p24_p2, %s648_s11, %s26_s22  }
  0x2c   : > { %p35_p8 = por %p34_p4, %p33_p1  ;;  %p883_p10 = scmp.eq.s32.totalorder %s698_s13, 1 }
  0x2d   : > { %s123_s18 = sand.u32 1, %s648_s11   ;;  %s434_s24 = sshll.u32 %s652_s12, 6 }
  0x2e   : > { %p768_p12 = por %p883_p10, %p33_p1  ;;  %s433_s25 = sshll.u32 %s123_s18, 2 }
  0x2f   : > { %s777_s27 = scalar_lea.hbm %s873_s0, %s434_s24  ;;  %s127_s19 = scalar_lea.vmem [#allocation2], %s433_s25 }
  0x30   : > { %s134_s22 = sshll.u32 %s127_s19, 4  ;;  %p779_p11 = pnand %p483_p6, %p35_p8  ;;  %s783_s22 = int_to_ptr.vmem [resolvable:$true] %s134_s22 }
  0x31   : > { %s124_s28 = scalar_lea.sflag [#allocation3], %s123_s18  ;;  %s552_s29 = scalar_lea.hbm %s777_s27, 64 }
  0x32   : > { %p553_p13 = scmp.ne.s32.totalorder %s777_s27, %s552_s29  ;;  %p554_p0 = pneg %p779_p11 }
  0x33   : > { %s557_s4 = scalar_lea.hbm %s873_s0, 128  ;;  %p558_p7 = scmp.lt.u32.totalorder %s777_s27, %s873_s0 }
  0x34   : > { %p555_p3 = pnand %p554_p0, %p553_p13  ;;  %p559_p9 = scmp.lt.u32.totalorder %s557_s4, %s552_s29 }
  0x35   : > { %p561_p1 = scmp.lt.u32.totalorder %s552_s29, %s777_s27 }
  0x36   : > { %p556_p5 = pneg %p555_p3  ;;  %p560_p2 = por %p559_p9, %p558_p7 }
  0x38   : > { %p562_p4 = por %p561_p1, %p560_p2 }
  0x3a   : > { %p563_p6 = pnand %p562_p4, %p556_p5 }
  0x3c   : > { %566 = shalt.err (!%p563_p6)
}
  0x3d   : > { %s567_s7 = scalar_lea.vmem %s783_s22, 64  ;;  %s657_s18 = smov [#allocation2]  }
  0x3e   : > { %p568_p8 = scmp.ne.s32.totalorder %s783_s22, %s567_s7  ;;  %s572_s24 = sshll.u32 %s657_s18, 4  ;;  %s573_s24 = int_to_ptr.vmem [resolvable:$false] %s572_s24 }
  0x3f   : > { %s574_s25 = scalar_lea.vmem %s573_s24, 128  ;;  %p575_p3 = scmp.lt.s32.totalorder %s783_s22, %s573_s24 }
  0x40   : > { %p570_p10 = pnand %p568_p8, %p554_p0  ;;  %p576_p7 = scmp.lt.s32.totalorder %s574_s25, %s567_s7 }
  0x42   : > { %p571_p13 = pneg %p570_p10  ;;  %p577_p9 = por %p576_p7, %p575_p3 }
  0x44   : > { %p578_p2 = pnand %p577_p9, %p571_p13 }
  0x46   : > { %581 = shalt.err (!%p578_p2)
}
  0x47   : > { %477 = dma.hbm_to_vmem [thread:$0]  (!%p779_p11), %s777_s27, 64, %s783_s22, %s124_s28  }
  0x48   : > { %p886_p5 = scmp.ne.s32.totalorder %s881_s17, 0 }
  0x49   : > { %s813_s20 = sand.u32 (!%p886_p5), 1, %s644_s10   ;;  %p887_p0 = scmp.ne.s32.totalorder (!%p886_p5), %s879_s15, 0 }
  0x4a   : > { %143 = sbr.rel (%p886_p5) target bundleno = 432 (0x1b0), region = 28  ;;  %s436_s26 = sshll.u32 (!%p886_p5), %s813_s20, 2 }
  0x4b   : > { %s146_s19 = scalar_lea.sflag (!%p886_p5), [#allocation3], %s813_s20  ;;  %s149_s29 = scalar_lea.vmem (!%p886_p5), [#allocation2], %s436_s26 }
  0x51   : > { %627 = dma.done.wait (%p887_p0), %s146_s19, 64  }
  0x52   : > { %629 = vsyncadd (%p887_p0), %s146_s19, 4294967232  ;;  %p888_p1 = scmp.eq.s32.totalorder %s698_s13, 0 }
  0x54   : > { %631 = dma.done.wait (%p888_p1), [#allocation6], 128   ;;  %p889_p11 = pmov %p888_p1 }
  0x55   : > { %v658_v0 = vmov 0.0   ;;  %vm659_vm0 = vmmov 0   ;;  %vm185_vm1 = vcmask 1043456   ;;  %vm181_vm2 = vcmask 31744   ;;  %v174_v1 = vld [vmem:[%s149_s29] sm:$0xf] }
  0x56   : > { %633 = vsyncadd (%p889_p11), [#allocation6], 4294967168  ;;  %456 = vmatprep.subr.mxu0 %v658_v0  ;;  %451 = vmatprep.subr.mxu1 %v658_v0  ;;  %v175_v2 = vld [vmem:[#allocation5] sm:$0xf]  ;;  %s660_s17 = smov 126   ;;  %s444_s15 = sshll.u32 %s698_s13, 6 }
  0x57   : > { %458 = vmatprep.mubr.msk.f32.mxu0 %vm659_vm0, %v658_v0  ;;  %453 = vmatprep.mubr.msk.f32.mxu1 %vm659_vm0, %v658_v0  ;;  %v177_v3 = vld [vmem:[#allocation5 + $0x4] sm:$0xf]  ;;  %s173_s27 = scalar_lea.vmem [#allocation7], %s436_s26  ;;  %vm333_vm3 = vcmask 109568   ;;  %s829_s30 = scalar_lea.hbm %s875_s2, %s444_s15 }
  0x58   : > { %179 = vrot.lane.b32.xlu0 %v174_v1, %s660_s17  ;;  %457 = vmatpush3.msk.msra.mxu0 %vm185_vm1, %v174_v1  ;;  %s349_s22 = sshll.u32 %s173_s27, 4  ;;  %s336_s3 = scalar_lea.sflag [#allocation4], %s813_s20  ;;  %s831_s22 = int_to_ptr.vmem [resolvable:$true] %s349_s22 }
  0x59   : > { %459 = vmatmul.mubr.msk.f32.vlgmr.msra.gmra.mrb[0].mxu0 %vm181_vm2, %v175_v2  ;;  %s582_s4 = scalar_lea.vmem %s831_s22, 64  ;;  %s661_s13 = smov [#allocation7]  }
  0x5a   : > { %p583_p4 = scmp.ne.s32.totalorder %s831_s22, %s582_s4  ;;  %s586_s5 = sshll.u32 %s661_s13, 4  ;;  %s587_s5 = int_to_ptr.vmem [resolvable:$false] %s586_s5 }
  0x5b   : > { %s588_s6 = scalar_lea.vmem %s587_s5, 128  ;;  %p589_p10 = scmp.lt.s32.totalorder %s831_s22, %s587_s5 }
  0x5c   : > { %p584_p6 = pnand %p583_p4, %p768_p12  ;;  %p590_p13 = scmp.lt.s32.totalorder %s588_s6, %s582_s4 }
  0x5e   : > { %p585_p8 = pneg %p584_p6  ;;  %p591_p3 = por %p590_p13, %p589_p10 }
  0x60   : > { %p592_p7 = pnand %p591_p3, %p585_p8 }
  0xca   : > { %v180_v4 = vpop.permute.xlu0 %179 }
  0xcb   : > { %452 = vmatpush3.msk.msra.mxu1 %vm185_vm1, %v180_v4 }
  0xcc   : > { %454 = vmatmul.mubr.msk.f32.vlgmr.msra.gmra.mrb[0].mxu1 %vm181_vm2, %v177_v3 }
 0x12c   : > { %v329_v5 = vpop.f32.mrb[0].mxu0 }
 0x12d   : > { %v460_v6 = vpop.f32.mrb[1].mxu0 }
 0x19f   : > { %v254_v7 = vpop.f32.mrb[0].mxu1 }
 0x1a0   : > { %v330_v8 = vadd.f32 %v329_v5, %v254_v7  ;;  %v455_v9 = vpop.f32.mrb[1].mxu1 }
 0x1a2   : > { %334 = vst.msk [vmem:[%s173_s27] sm:$0xf] %vm333_vm3, %v330_v8 }
 0x1a3   : > { %595 = shalt.err (!%p592_p7)
}
 0x1a4   : > { %s596_s7 = scalar_lea.hbm %s829_s30, 64  ;;  %s600_s25 = scalar_lea.hbm %s875_s2, 128 }
 0x1a5   : > { %p597_p9 = scmp.ne.s32.totalorder %s829_s30, %s596_s7  ;;  %p601_p0 = scmp.lt.u32.totalorder %s829_s30, %s875_s2 }
 0x1a6   : > { %p602_p1 = scmp.lt.u32.totalorder %s600_s25, %s596_s7  ;;  %p604_p4 = scmp.lt.u32.totalorder %s596_s7, %s829_s30 }
 0x1a7   : > { %p598_p2 = pnand %p597_p9, %p768_p12 }
 0x1a8   : > { %p603_p11 = por %p602_p1, %p601_p0 }
 0x1a9   : > { %p599_p5 = pneg %p598_p2 }
 0x1aa   : > { %p605_p6 = por %p604_p4, %p603_p11 }
 0x1ac   : > { %p606_p8 = pnand %p605_p6, %p599_p5 }
 0x1ae   : > { %609 = shalt.err (!%p606_p8)
}
 0x1af   : > { %468 = dma.vmem_to_hbm [thread:$0]  (%p768_p12), %s831_s22, 64, %s829_s30, %s336_s3  }
 0x1b0 PF: > { %s361_s19 = sand.u32 1, %s640_s9   ;;  %p890_p10 = scmp.ne.s32.totalorder %s880_s16, 0 }
 0x1b1   : > { %p891_p13 = scmp.ge.s32.totalorder %s652_s12, 2  ;;  %s362_s29 = scalar_lea.sflag [#allocation4], %s361_s19 }
 0x1b3   : > { %p479_p3 = pnand %p891_p13, %p890_p10 }
 0x1b5   : > { %635 = dma.done.wait (!%p479_p3), %s362_s29, 64  }
 0x1b6   : > { %637 = vsyncadd (!%p479_p3), %s362_s29, 4294967232  ;;  %p16_p7 = scmp.ge.s32.totalorder %s733_s21, 4   ;;  %s892_s9 = smov %s644_s10 }
 0x1b7   : > { %s893_s10 = smov %s648_s11  ;;  %s894_s11 = smov %s764_s8 }
 0x1b8   : > { %s895_s12 = smov %s733_s21  ;;  %18 = sbr.rel (!%p16_p7) target bundleno = 6 (0x6), region = 78 }
 0x1bf   :  { %367 = vsyncpa [#allocation3], 1 }
 0x1c0   :  { %369 = vsyncpa [#allocation3 + $0x1], 1 }
 0x1c1   :  { %370 = vsyncpa [#allocation6], 1 }
 0x1c2   :  { %371 = vsyncpa [#allocation4], 1 }
 0x1c3   :  { %373 = vsyncpa [#allocation4 + $0x1], 1 }

</bundles_post_ra>
